<compile_context>
chip_gen: v7x
topology: tpu7x:2x2x1
jax: 0.10.0
libtpu: 0.0.40
codegen_flags: <defaults>
</compile_context>

<pallas_src>
import functools

import jax
import jax.numpy as jnp
import numpy as np
from jax.experimental import pallas as pl
from jax.experimental.pallas import tpu as pltpu

_EPS = 1e-5
_MXU_DTYPE = jnp.bfloat16      # matmul operand / intermediate activation dtype
_MAX_BANDED_LANES = 2048       # gate for the banded-weight formulation
_MAX_BANDED_WIDTH = 64


# ----------------------------------------------------------------------------
# Kernels
# ----------------------------------------------------------------------------
def _shifted_operand(x, img_h):
    """Build [x(row-1) | x(row) | x(row+1)] along lanes (K = 3*W*C), with zero
    rows at each image's top/bottom (== the conv's zero padding in H).

    Shifts use pltpu.roll on the aligned tile (XLU slot) + an iota mask, so no
    sublane-misaligned slices and no halo rows are needed: every tile holds an
    integer number of whole images, hence every "bleed" row is a masked row.
    """
    th = x.shape[0]
    ridx = jax.lax.broadcasted_iota(jnp.int32, (th, 1), 0)
    zero = jnp.zeros_like(x)
    up = jnp.where((ridx % img_h) == 0, zero,
                   pltpu.roll(x, shift=1, axis=0))           # row r -> x[r-1]
    dn = jnp.where((ridx % img_h) == img_h - 1, zero,
                   pltpu.roll(x, shift=th - 1, axis=0))      # row r -> x[r+1]
    return jnp.concatenate([up, x, dn], axis=1)


def _store_with_stats(acc, out_ref, st_ref):
    """Store bf16 activations + per-tile (sum, sum_sq) BN partials.

    Stats are taken from the bf16-rounded values, so they are exactly
    consistent with the tensor the next pass normalizes."""
    q = acc.astype(out_ref.dtype)
    out_ref[...] = q
    f = q.astype(jnp.float32)
    st_ref[0, :, :] = jnp.concatenate(
        [jnp.sum(f, axis=0, keepdims=True),
         jnp.sum(f * f, axis=0, keepdims=True)], axis=0)


def _conv1_kernel(x_ref, w_ref, h_ref, st_ref, *, img_h):
    """3x3 conv as ONE matmul (K = 3*W*Cin) + per-tile BN1 partial stats.
    Accepts f32 input; the bf16 cast happens in-kernel (no wrapper round trip)."""
    x = x_ref[...].astype(jnp.float32)
    xk = _shifted_operand(x, img_h).astype(_MXU_DTYPE)        # (TH, 3*W*Cin)
    acc = jnp.dot(xk, w_ref[...], preferred_element_type=jnp.float32)
    _store_with_stats(acc, h_ref, st_ref)


def _bn_relu_conv2_kernel(h_ref, sc_ref, sh_ref, w_ref, y_ref, st_ref, *, img_h):
    """BN1 (precomputed scale/shift lane vectors) + ReLU + 3x3 conv (one
    matmul, K = 3*W*Cout) + per-tile BN2 partial stats."""
    act = jnp.maximum(
        h_ref[...].astype(jnp.float32) * sc_ref[...] + sh_ref[...], 0.0)
    ak = _shifted_operand(act, img_h).astype(_MXU_DTYPE)      # (TH, 3*W*Cout)
    acc = jnp.dot(ak, w_ref[...], preferred_element_type=jnp.float32)
    _store_with_stats(acc, y_ref, st_ref)


def _bn_relu_kernel(y_ref, sc_ref, sh_ref, o_ref):
    """Final BN2 + ReLU: pure lane-dense streaming FMA.
    (f32 output kept for PyTorch parity; emit bf16 if the consumer allows.)"""
    o_ref[...] = jnp.maximum(
        y_ref[...].astype(jnp.float32) * sc_ref[...] + sh_ref[...], 0.0)


# ----------------------------------------------------------------------------
# Wrapper-side one-time preparation (outside the hot path)
# ----------------------------------------------------------------------------
def _banded_weights_k(w_oihw, width):
    """Fold the horizontal taps + width zero-padding of a 3x3 conv into
    block-banded matrices and stack the 3 vertical taps along K:
    shape (3*W*Cin, W*Cout); row = kh*(W*Cin) + wi*Cin + ci, col = wo*Cout + co."""
    wt = jnp.transpose(w_oihw, (2, 3, 1, 0)).astype(jnp.float32)   # (3,3,Cin,Cout)
    c_in, c_out = int(wt.shape[2]), int(wt.shape[3])
    bands = []
    for kh in range(3):
        b = jnp.zeros((width * c_in, width * c_out), jnp.float32)
        for kw in range(3):
            sel = jnp.eye(width, width, k=1 - kw, dtype=jnp.float32)  # wi = wo + kw - 1
            b = b + jnp.kron(sel, wt[kh, kw])
        bands.append(b)
    return jnp.concatenate(bands, axis=0)


def _bn_scale_shift(partials, gamma, beta, width, channels, count):
    """Global training-mode BN from per-tile (sum, sum_sq) partials.
    Tiny plain-JAX reduction — hoisted out of the per-tile kernels, and the
    channel reduction is a reshape + sum over W (no (W*C)^2 matrix)."""
    tot = jnp.sum(partials, axis=0)                      # (2, W*C)
    tot = tot.reshape(2, width, channels).sum(axis=1)    # (2, C)
    mean = tot[0] / count
    # Biased variance via E[x^2]-E[x]^2 in f32; clamp tiny negatives.
    # TODO(synk): Welford / shifted accumulation if mean >> std becomes an issue.
    var = jnp.maximum(tot[1] / count - mean * mean, 0.0)
    scale = gamma.astype(jnp.float32) * jax.lax.rsqrt(var + _EPS)
    shift = beta.astype(jnp.float32) - mean * scale
    # lane vector: value[c] at lane w*C + c
    return (jnp.tile(scale[None, :], (1, width)),
            jnp.tile(shift[None, :], (1, width)))


def _vmem_limit_bytes():
    """Generation-dependent VMEM budget (v7x has 64 MiB/TC, v5e/v6e 128 MiB)."""
    vmem = None
    try:
        info = pltpu.get_tpu_info()
        for name in ("vmem_capacity_bytes", "vmem_size_bytes", "vmem_bytes"):
            v = getattr(info, name, None)
            if v:
                vmem = int(v)
                break
    except Exception:
        vmem = None
    if not vmem:
        vmem = 64 * 1024 * 1024            # conservative (v7x per-TC)
    # Leave headroom for Mosaic internal scratch + pipeline double buffers.
    return int(max(32 * 1024 * 1024, min(vmem * 3 // 4, 100 * 1024 * 1024)))


def _tile_rows(n, h, wcin, wcout, vmem_limit):
    """Rows per grid step = (whole images per tile) * H, sized from the VMEM
    budget.  Prefers >=2 grid steps when N >= 2 so both v7x TensorCores work;
    at larger shapes the per-step M grows toward 256-512 rows."""
    per_row = (2 * (4 * wcin + 2 * wcout)          # f32 in + bf16 out tiles, x2 buffers
               + 4 * 3 * wcin + 2 * 3 * wcin       # f32 shifted chunks + bf16 K-operand
               + 2 * 3 * wcout + 4 * wcout)        # conv2 operand + f32 accumulator
    weights = 2 * 3 * max(wcin, wcout) * wcout     # largest bf16 band matrix
    budget = max(vmem_limit - 4 * weights, vmem_limit // 4)
    target = min(512, budget // (2 * max(per_row, 1)))
    if h > target:
        raise NotImplementedError(
            "TODO(synk): within-image row tiling (1-row halo carry) for images "
            "taller than the per-step VMEM row budget")
    best_k = 1
    for k in range(1, n + 1):
        if n % k == 0 and k * h <= target and (n // k >= 2 or n == 1):
            best_k = k
    th = best_k * h
    if th % 8 != 0 and n // best_k > 1:
        # Keep block row extents sublane friendly: fall back to one full tile
        # (block == full array extent is always legal).
        best_k, th = n, n * h
    return th, n // best_k


# ----------------------------------------------------------------------------
# Wrapper
# ----------------------------------------------------------------------------
def double_conv_rows(x_rows, w1, g1, b1, w2, g2, b2):
    """Production entry point on the lane-dense layout.
    x_rows: (N, H, W*Cin) float32.  Returns (N, H, W*Cout) float32."""
    n, h, wcin = (int(s) for s in x_rows.shape)
    c_out, c_in = int(w1.shape[0]), int(w1.shape[1])
    width = wcin // c_in
    wc = width * c_out
    assert width * c_in == wcin, "channel axis must be fused into the lane axis"

    # The banded-weight trick costs O(W^2) memory and MXU FLOPs; gate it.
    if max(wcin, wc) > _MAX_BANDED_LANES or width > _MAX_BANDED_WIDTH:
        raise NotImplementedError(
            "TODO(synk): per-tap (3*Cin->Cout) / lane-axis im2col formulation "
            "for large W*C; banded weights scale O(W^2)")

    vmem_limit = _vmem_limit_bytes()
    th, n_tiles = _tile_rows(n, h, wcin, wc, vmem_limit)
    rows = n * h
    count = float(rows * width)                    # N*H*W elements per channel

    wb1 = _banded_weights_k(w1, width).astype(_MXU_DTYPE)   # (3*W*Cin,  W*Cout)
    wb2 = _banded_weights_k(w2, width).astype(_MXU_DTYPE)   # (3*W*Cout, W*Cout)

    x_flat = x_rows.reshape(rows, wcin)            # batch folded into matmul M

    grid = (n_tiles,)
    params = pltpu.CompilerParams(
        dimension_semantics=("parallel",),
        vmem_limit_bytes=vmem_limit)

    def tile_spec(lanes):
        return pl.BlockSpec((th, lanes), lambda t: (t, 0))

    def const_spec(shape):
        nd = len(shape)
        # Constant block index: not re-copied per grid step by the pipeliner.
        return pl.BlockSpec(tuple(shape), lambda t: (0,) * nd)

    st_shape = jax.ShapeDtypeStruct((n_tiles, 2, wc), jnp.float32)
    st_spec = pl.BlockSpec((1, 2, wc), lambda t: (t, 0, 0))

    # ---- pass 1: conv1 (one K=3*W*Cin matmul) + per-tile BN1 partials -------
    h_pre, st1 = pl.pallas_call(
        functools.partial(_conv1_kernel, img_h=h),
        grid=grid,
        in_specs=[tile_spec(wcin), const_spec(wb1.shape)],
        out_specs=[tile_spec(wc), st_spec],
        out_shape=[jax.ShapeDtypeStruct((rows, wc), _MXU_DTYPE), st_shape],
        compiler_params=params,
        cost_estimate=pl.CostEstimate(
            flops=int(2 * rows * 3 * wcin * wc),
            transcendentals=0,
            bytes_accessed=int(rows * wcin * 4 + wb1.size * 2
                               + rows * wc * 2 + n_tiles * 2 * wc * 4)),
    )(x_flat, wb1)

    # ---- global BN1 scale/shift (tiny plain-JAX reduction, hoisted) ---------
    sc1, sh1 = _bn_scale_shift(st1, g1, b1, width, c_out, count)

    # ---- pass 2: BN1 + ReLU + conv2 + per-tile BN2 partials ------------------
    y_pre, st2 = pl.pallas_call(
        functools.partial(_bn_relu_conv2_kernel, img_h=h),
        grid=grid,
        in_specs=[tile_spec(wc), const_spec(sc1.shape), const_spec(sh1.shape),
                  const_spec(wb2.shape)],
        out_specs=[tile_spec(wc), st_spec],
        out_shape=[jax.ShapeDtypeStruct((rows, wc), _MXU_DTYPE), st_shape],
        compiler_params=params,
        cost_estimate=pl.CostEstimate(
            flops=int(2 * rows * 3 * wc * wc + 8 * rows * wc),
            transcendentals=0,
            bytes_accessed=int(rows * wc * 2 + wb2.size * 2 + 2 * wc * 4
                               + rows * wc * 2 + n_tiles * 2 * wc * 4)),
    )(h_pre, sc1, sh1, wb2)

    # ---- global BN2 scale/shift ----------------------------------------------
    sc2, sh2 = _bn_scale_shift(st2, g2, b2, width, c_out, count)

    # ---- pass 3: BN2 + ReLU (pure lane-dense streaming FMA) -----------------
    out_flat = pl.pallas_call(
        _bn_relu_kernel,
        grid=grid,
        in_specs=[tile_spec(wc), const_spec(sc2.shape), const_spec(sh2.shape)],
        out_specs=tile_spec(wc),
        out_shape=jax.ShapeDtypeStruct((rows, wc), jnp.float32),
        compiler_params=params,
        cost_estimate=pl.CostEstimate(
            flops=int(3 * rows * wc),
            transcendentals=0,
            bytes_accessed=int(rows * wc * 2 + 2 * wc * 4 + rows * wc * 4)),
    )(y_pre, sc2, sh2)

    return out_flat.reshape(n, h, wc)


def double_conv_pallas(x_nchw, w1, g1, b1, w2, g2, b2):
    """PyTorch-layout adapter: x (N, Cin, H, W) f32 -> (N, Cout, H, W) f32.
    The NCHW <-> row-slab transposes are interface plumbing only; callers that
    already hold NHWC data should use double_conv_rows directly."""
    n, c_in, h, w = x_nchw.shape
    c_out = int(w1.shape[0])
    x_rows = jnp.transpose(x_nchw, (0, 2, 3, 1)).reshape(n, h, w * c_in)
    out_rows = double_conv_rows(x_rows, w1, g1, b1, w2, g2, b2)
    return jnp.transpose(out_rows.reshape(n, h, w, c_out), (0, 3, 1, 2))


# ----------------------------------------------------------------------------
# Pure-JAX reference (f32) for correctness checking.
# ----------------------------------------------------------------------------
def double_conv_ref(x, w1, g1, b1, w2, g2, b2):
    def conv(x_, w_):
        return jax.lax.conv_general_dilated(
            x_, w_, window_strides=(1, 1), padding=((1, 1), (1, 1)),
            dimension_numbers=("NCHW", "OIHW", "NCHW"))

    def bn_relu(x_, g_, b_):
        mean = jnp.mean(x_, axis=(0, 2, 3), keepdims=True)
        var = jnp.mean((x_ - mean) ** 2, axis=(0, 2, 3), keepdims=True)
        y = (x_ - mean) * jax.lax.rsqrt(var + _EPS)
        y = y * g_[None, :, None, None] + b_[None, :, None, None]
        return jnp.maximum(y, 0.0)

    h = bn_relu(conv(x, w1), g1, b1)
    return bn_relu(conv(h, w2), g2, b2)


if __name__ == "__main__":
    N, C_IN, C_OUT, H, W = 2, 4, 8, 16, 16

    key = jax.random.PRNGKey(0)
    k_x, k_w1, k_w2, k_g1, k_b1, k_g2, k_b2 = jax.random.split(key, 7)

    x = jax.random.normal(k_x, (N, C_IN, H, W), jnp.float32)
    # PyTorch Conv2d weight layout is OIHW; bias=False.
    w1 = 0.3 * jax.random.normal(k_w1, (C_OUT, C_IN, 3, 3), jnp.float32)
    w2 = 0.3 * jax.random.normal(k_w2, (C_OUT, C_OUT, 3, 3), jnp.float32)
    g1 = 1.0 + 0.1 * jax.random.normal(k_g1, (C_OUT,), jnp.float32)
    b1 = 0.1 * jax.random.normal(k_b1, (C_OUT,), jnp.float32)
    g2 = 1.0 + 0.1 * jax.random.normal(k_g2, (C_OUT,), jnp.float32)
    b2 = 0.1 * jax.random.normal(k_b2, (C_OUT,), jnp.float32)

    out = jax.block_until_ready(double_conv_pallas(x, w1, g1, b1, w2, g2, b2))
    ref = jax.block_until_ready(double_conv_ref(x, w1, g1, b1, w2, g2, b2))

    # bf16 MXU operands / bf16 activation storage -> compare against the f32
    # reference with a bf16-level tolerance.
    np.testing.assert_allclose(np.asarray(out), np.asarray(ref),
                               rtol=5e-2, atol=5e-2)
    print("KERNEL_OK")
</pallas_src>

<mosaic_0001>
module attributes {stable_mosaic.version = 11 : i64} {
  func.func @_conv1_kernel(%arg0: i32, %arg1: memref<16x64xf32, #tpu.memory_space<vmem>>, %arg2: memref<192x128xbf16, #tpu.memory_space<vmem>>, %arg3: memref<16x128xbf16, #tpu.memory_space<vmem>>, %arg4: memref<1x2x128xf32, #tpu.memory_space<vmem>>) attributes {dimension_semantics = [#tpu.dimension_semantics<parallel>], iteration_bounds = array<i64: 2>, scalar_prefetch = 0 : i64, scratch_operands = 0 : i64, tpu.core_type = #tpu.core_type<tc>, window_params = [{transform_indices = @transform_0, window_bounds = array<i64: 16, 64>}, {pipeline_mode = #tpu.pipeline_mode<synchronous>, transform_indices = @transform_1, window_bounds = array<i64: 192, 128>}, {transform_indices = @transform_2, window_bounds = array<i64: 16, 128>}, {transform_indices = @transform_3, window_bounds = array<i64: 1, 2, 128>}]} {
    %c0 = arith.constant 0 : index
    %c0_0 = arith.constant 0 : index
    %0 = vector.load %arg1[%c0, %c0_0] : memref<16x64xf32, #tpu.memory_space<vmem>>, vector<16x64xf32>
    %1 = tpu.iota {dimensions = array<i32: 0>} : vector<16x1xi32>
    %cst = arith.constant 0.000000e+00 : f32
    %2 = vector.broadcast %cst : f32 to vector<16x64xf32>
    %c16_i32 = arith.constant 16 : i32
    %c0_i32 = arith.constant 0 : i32
    %3 = arith.cmpi eq, %c16_i32, %c0_i32 : i32
    %c1_i32 = arith.constant 1 : i32
    %4 = arith.select %3, %c1_i32, %c16_i32 : i32
    %5 = vector.broadcast %4 : i32 to vector<16x1xi32>
    %6 = arith.remsi %1, %5 : vector<16x1xi32>
    %c0_i32_1 = arith.constant 0 : i32
    %7 = vector.broadcast %c0_i32_1 : i32 to vector<16x1xi32>
    %8 = arith.cmpi ne, %6, %7 : vector<16x1xi32>
    %c0_i32_2 = arith.constant 0 : i32
    %9 = vector.broadcast %c0_i32_2 : i32 to vector<16x1xi32>
    %10 = arith.cmpi slt, %6, %9 : vector<16x1xi32>
    %c0_i32_3 = arith.constant 0 : i32
    %11 = arith.cmpi slt, %4, %c0_i32_3 : i32
    %12 = vector.broadcast %11 : i1 to vector<16x1xi1>
    %13 = vector.broadcast %12 : vector<16x1xi1> to vector<16x1xi1>
    %14 = arith.xori %10, %13 : vector<16x1xi1>
    %15 = arith.andi %14, %8 : vector<16x1xi1>
    %16 = vector.broadcast %4 : i32 to vector<16x1xi32>
    %17 = arith.addi %6, %16 : vector<16x1xi32>
    %18 = arith.select %15, %17, %6 : vector<16x1xi1>, vector<16x1xi32>
    %c0_i32_4 = arith.constant 0 : i32
    %19 = vector.broadcast %c0_i32_4 : i32 to vector<16x1xi32>
    %20 = arith.cmpi eq, %18, %19 : vector<16x1xi32>
    %c1_i32_5 = arith.constant 1 : i32
    %21 = tpu.dynamic_rotate %0 by %c1_i32_5 dim 0 : vector<16x64xf32>, i32 -> vector<16x64xf32>
    %22 = vector.shape_cast %20 : vector<16x1xi1> to vector<16x1xi1>
    %23 = vector.broadcast %22 : vector<16x1xi1> to vector<16x64xi1>
    %24 = arith.select %23, %2, %21 : vector<16x64xi1>, vector<16x64xf32>
    %c16_i32_6 = arith.constant 16 : i32
    %c0_i32_7 = arith.constant 0 : i32
    %25 = arith.cmpi eq, %c16_i32_6, %c0_i32_7 : i32
    %c1_i32_8 = arith.constant 1 : i32
    %26 = arith.select %25, %c1_i32_8, %c16_i32_6 : i32
    %27 = vector.broadcast %26 : i32 to vector<16x1xi32>
    %28 = arith.remsi %1, %27 : vector<16x1xi32>
    %c0_i32_9 = arith.constant 0 : i32
    %29 = vector.broadcast %c0_i32_9 : i32 to vector<16x1xi32>
    %30 = arith.cmpi ne, %28, %29 : vector<16x1xi32>
    %c0_i32_10 = arith.constant 0 : i32
    %31 = vector.broadcast %c0_i32_10 : i32 to vector<16x1xi32>
    %32 = arith.cmpi slt, %28, %31 : vector<16x1xi32>
    %c0_i32_11 = arith.constant 0 : i32
    %33 = arith.cmpi slt, %26, %c0_i32_11 : i32
    %34 = vector.broadcast %33 : i1 to vector<16x1xi1>
    %35 = vector.broadcast %34 : vector<16x1xi1> to vector<16x1xi1>
    %36 = arith.xori %32, %35 : vector<16x1xi1>
    %37 = arith.andi %36, %30 : vector<16x1xi1>
    %38 = vector.broadcast %26 : i32 to vector<16x1xi32>
    %39 = arith.addi %28, %38 : vector<16x1xi32>
    %40 = arith.select %37, %39, %28 : vector<16x1xi1>, vector<16x1xi32>
    %c15_i32 = arith.constant 15 : i32
    %41 = vector.broadcast %c15_i32 : i32 to vector<16x1xi32>
    %42 = arith.cmpi eq, %40, %41 : vector<16x1xi32>
    %c15_i32_12 = arith.constant 15 : i32
    %43 = tpu.dynamic_rotate %0 by %c15_i32_12 dim 0 : vector<16x64xf32>, i32 -> vector<16x64xf32>
    %44 = vector.shape_cast %42 : vector<16x1xi1> to vector<16x1xi1>
    %45 = vector.broadcast %44 : vector<16x1xi1> to vector<16x64xi1>
    %46 = arith.select %45, %2, %43 : vector<16x64xi1>, vector<16x64xf32>
    %47 = tpu.concatenate %24, %0, %46 in 1 : vector<16x64xf32>, vector<16x64xf32>, vector<16x64xf32> -> vector<16x192xf32>
    %48 = arith.truncf %47 : vector<16x192xf32> to vector<16x192xbf16>
    %c0_13 = arith.constant 0 : index
    %c0_14 = arith.constant 0 : index
    %49 = vector.load %arg2[%c0_13, %c0_14] : memref<192x128xbf16, #tpu.memory_space<vmem>>, vector<192x128xbf16>
    %cst_15 = arith.constant dense<0.000000e+00> : vector<16x128xf32>
    %50 = tpu.matmul %48, %49, %cst_15 {dimension_numbers = #tpu.dot_dimension_numbers<[1], [0], [0], [1], [0, 0, 1, 1], [], []>} : vector<16x192xbf16>, vector<192x128xbf16>, vector<16x128xf32> -> vector<16x128xf32>
    %51 = arith.truncf %50 : vector<16x128xf32> to vector<16x128xbf16>
    %c0_16 = arith.constant 0 : index
    %c0_17 = arith.constant 0 : index
    %52 = vector.load %arg3[%c0_16, %c0_17] : memref<16x128xbf16, #tpu.memory_space<vmem>>, vector<16x128xbf16>
    tpu.vector_store %arg3[%c0_16, %c0_17], %51 {strides = array<i32>} : memref<16x128xbf16, #tpu.memory_space<vmem>>, vector<16x128xbf16>,
    %53 = arith.extf %51 : vector<16x128xbf16> to vector<16x128xf32>
    %cst_18 = arith.constant dense<0.000000e+00> : vector<128xf32>
    %54 = vector.multi_reduction <add>, %53, %cst_18 [0] : vector<16x128xf32> to vector<128xf32>
    %55 = vector.shape_cast %54 : vector<128xf32> to vector<1x128xf32>
    %56 = arith.mulf %53, %53 : vector<16x128xf32>
    %cst_19 = arith.constant dense<0.000000e+00> : vector<128xf32>
    %57 = vector.multi_reduction <add>, %56, %cst_19 [0] : vector<16x128xf32> to vector<128xf32>
    %58 = vector.shape_cast %57 : vector<128xf32> to vector<1x128xf32>
    %59 = tpu.concatenate %55, %58 in 0 : vector<1x128xf32>, vector<1x128xf32> -> vector<2x128xf32>
    %c0_20 = arith.constant 0 : index
    %c0_21 = arith.constant 0 : index
    %c0_22 = arith.constant 0 : index
    %60 = vector.load %arg4[%c0_20, %c0_21, %c0_22] : memref<1x2x128xf32, #tpu.memory_space<vmem>>, vector<1x2x128xf32>
    %61 = vector.shape_cast %60 : vector<1x2x128xf32> to vector<2x128xf32>
    %62 = vector.shape_cast %59 : vector<2x128xf32> to vector<1x2x128xf32>
    tpu.vector_store %arg4[%c0_20, %c0_21, %c0_22], %62 {strides = array<i32>} : memref<1x2x128xf32, #tpu.memory_space<vmem>>, vector<1x2x128xf32>,
    return
  }
  func.func @transform_0(%arg0: i32) -> (i32, i32) {
    %c0_i32 = arith.constant 0 : i32
    %c0_i32_0 = arith.constant 0 : i32
    return %arg0, %c0_i32 : i32, i32
  }
  func.func @transform_1(%arg0: i32) -> (i32, i32) {
    %c0_i32 = arith.constant 0 : i32
    %c0_i32_0 = arith.constant 0 : i32
    %c0_i32_1 = arith.constant 0 : i32
    return %c0_i32, %c0_i32_0 : i32, i32
  }
  func.func @transform_2(%arg0: i32) -> (i32, i32) {
    %c0_i32 = arith.constant 0 : i32
    %c0_i32_0 = arith.constant 0 : i32
    return %arg0, %c0_i32 : i32, i32
  }
  func.func @transform_3(%arg0: i32) -> (i32, i32, i32) {
    %c0_i32 = arith.constant 0 : i32
    %c0_i32_0 = arith.constant 0 : i32
    %c0_i32_1 = arith.constant 0 : i32
    return %arg0, %c0_i32, %c0_i32_0 : i32, i32, i32
  }
}

</mosaic_0001>

<bundles_post_ra>
// kernel: tpu_custom_call.1
= control target key start
LH: loop header
LB: loop body
LE: loop exit
PB: predicated region body
PF: predicated region fallthrough
CT: control target
= control target key end

     0   :  { %9 = vsyncpa [#allocation3], 0  ;;  %s1175_s0 = inlined_call_operand.hbm [shape: f32[32,64], index: 0, kind: input, shape index: {}]   ;;  %s1176_s1 = inlined_call_operand.hbm [shape: bf16[192,128], index: 1, kind: input, shape index: {}]   ;;  %s1177_s2 = inlined_call_operand.hbm [shape: bf16[32,128], index: 2, kind: output, shape index: {0}]   ;;  %s1178_s3 = inlined_call_operand.hbm [shape: f32[2,2,128], index: 3, kind: output, shape index: {1}]  }
   0x1   :  { %11 = vsyncpa [#allocation3 + $0x1], 0 }
   0x2   :  { %12 = vsyncpa [#allocation6], 0 }
   0x3   :  { %13 = vsyncpa [#allocation4], 0 }
   0x4   :  { %15 = vsyncpa [#allocation4 + $0x1], 0 }
   0x5   :  { %16 = vsyncpa [#allocation9], 0 }
   0x6   :  { %18 = vsyncpa [#allocation9 + $0x1], 0  ;;  %s926_s12 = smov 0   ;;  %s928_s13 = smov 0  }
   0x7   :  { %s930_s14 = smov 0   ;;  %s932_s15 = smov 0  }
   0x8 LB: > { %s947_s16 = sadd.s32 4294967295, %s893_s15   ;;  %s604_s17 = sadd.s32 4294967294, %s893_s15   ;;  %s893_s15 = sphi %s932_s15, %s1200_s15   ;;  %s889_s14 = sphi %s930_s14, %s1199_s14   ;;  %s885_s13 = sphi %s928_s13, %s1198_s13   ;;  %s881_s12 = sphi %s926_s12, %s1197_s12  }
   0x9   : > { %p44_p0 = scmp.ne.s32.totalorder %s885_s13, %s881_s12  ;;  %p1179_p1 = scmp.eq.s32.totalorder %s947_s16, 0 }
   0xa   : > { %p95_p3 = scmp.eq.s32.totalorder %s604_s17, 1  ;;  %p605_p5 = scmp.ge.s32.totalorder %s893_s15, 1 }
   0xb   : > { %p956_p4 = por %p1179_p1, %p44_p0  ;;  %p128_p7 = scmp.lt.s32.totalorder %s893_s15, 3 }
   0xc   : > { %p961_p6 = por %p95_p3, %p44_p0  ;;  %s895_s21 = smov [#allocation5]  }
   0xd   : > { %s1182_s18 = scalar_select %p956_p4, 1, 0 }
   0xe   : > { %s1183_s19 = scalar_select %p961_p6, 1, 0 }
   0xf   : > { %p966_p8 = pnand %p605_p5, %p128_p7  ;;  %s140_s22 = sshll.u32 %s895_s21, 4  ;;  %s970_s22 = int_to_ptr.vmem [resolvable:$true] %s140_s22 }
  0x10   : > { %s982_s24 = sadd.s32 1, %s893_s15   ;;  %s31_s25 = sadd.s32 1, %s889_s14 }
  0x11   : > { %s1184_s20 = scalar_select %p966_p8, 1, 0 }
  0x12   : > { %p657_p9 = pneg %p966_p8  ;;  %s28_s26 = ssub.s32 %s893_s15, %s982_s24 }
  0x13   : > { %s733_s29 = scalar_lea.hbm %s1176_s1, 1536 }
  0x14   : > { %p977_p11 = pnand %p657_p9, %p1179_p1  ;;  %p734_p12 = scmp.ne.s32.totalorder %s1176_s1, %s733_s29 }
  0x15   : > { %p740_p5 = scmp.lt.u32.totalorder %s733_s29, %s1176_s1 }
  0x16   : > { %p735_p13 = pneg %p977_p11 }
  0x18   : > { %p736_p0 = pnand %p735_p13, %p734_p12 }
  0x1a   : > { %p737_p3 = pneg %p736_p0 }
  0x1c   : > { %p742_p7 = pnand %p740_p5, %p737_p3 }
  0x1e   : > { %745 = shalt.err (!%p742_p7)
}
  0x1f   : > { %s746_s7 = scalar_lea.vmem %s970_s22, 1536  ;;  %p754_p2 = scmp.lt.s32.totalorder %s970_s22, %s970_s22 }
  0x20   : > { %p747_p9 = scmp.ne.s32.totalorder %s970_s22, %s746_s7  ;;  %p755_p6 = scmp.lt.s32.totalorder %s746_s7, %s746_s7 }
  0x22   : > { %p749_p10 = pnand %p747_p9, %p735_p13  ;;  %p756_p4 = por %p755_p6, %p754_p2 }
  0x24   : > { %p750_p1 = pneg %p749_p10 }
  0x26   : > { %p757_p8 = pnand %p756_p4, %p750_p1 }
  0x28   : > { %760 = shalt.err (!%p757_p8)
}
  0x29   : > { %s896_s8 = smov 64   ;;  %s897_s9 = smov 4  }
  0x2a   : > { %660 = dma.hbm_to_vmem [thread:$0]  (!%p977_p11), %s1176_s1, 1536, %s970_s22, [#allocation6], %s896_s8, %s896_s8, %s897_s9  }
  0x2b   : > { %p29_p2 = scmp.eq.s32.totalorder %s28_s26, 0  ;;  %p38_p1 = scmp.ne.s32.totalorder %s889_s14, %s885_s13 }
  0x2c   : > { %p39_p4 = scmp.eq.s32.totalorder %s893_s15, 0  ;;  %p673_p6 = scmp.lt.s32.totalorder %s893_s15, 2 }
  0x2d   : > { %s1013_s17 = scalar_select %p29_p2, %s889_s14, %s31_s25  }
  0x2e   : > { %p40_p8 = por %p39_p4, %p38_p1  ;;  %p1186_p10 = scmp.eq.s32.totalorder %s947_s16, 1 }
  0x2f   : > { %s154_s27 = sand.u32 1, %s889_s14   ;;  %s638_s28 = sshll.u32 %s893_s15, 8 }
  0x30   : > { %p1017_p12 = por %p1186_p10, %p38_p1  ;;  %s608_s29 = sshll.u32 %s154_s27, 4 }
  0x31   : > { %s1026_s4 = scalar_lea.hbm %s1175_s0, %s638_s28  ;;  %s158_s22 = scalar_lea.vmem [#allocation2], %s608_s29 }
  0x32   : > { %s165_s25 = sshll.u32 %s158_s22, 4  ;;  %p1028_p11 = pnand %p673_p6, %p40_p8  ;;  %s1032_s25 = int_to_ptr.vmem [resolvable:$true] %s165_s25 }
  0x33   : > { %s1034_s5 = scalar_lea.sflag [#allocation3], %s154_s27  ;;  %s761_s6 = scalar_lea.hbm %s1026_s4, 256 }
  0x34   : > { %p762_p13 = scmp.ne.s32.totalorder %s1026_s4, %s761_s6  ;;  %p763_p0 = pneg %p1028_p11 }
  0x35   : > { %s766_s9 = scalar_lea.hbm %s1175_s0, 512  ;;  %p767_p7 = scmp.lt.u32.totalorder %s1026_s4, %s1175_s0 }
  0x36   : > { %p764_p3 = pnand %p763_p0, %p762_p13  ;;  %p768_p9 = scmp.lt.u32.totalorder %s766_s9, %s761_s6 }
  0x37   : > { %p770_p1 = scmp.lt.u32.totalorder %s761_s6, %s1026_s4 }
  0x38   : > { %p765_p5 = pneg %p764_p3  ;;  %p769_p2 = por %p768_p9, %p767_p7 }
  0x3a   : > { %p771_p4 = por %p770_p1, %p769_p2 }
  0x3c   : > { %p772_p6 = pnand %p771_p4, %p765_p5 }
  0x3e   : > { %775 = shalt.err (!%p772_p6)
}
  0x3f   : > { %s776_s27 = scalar_lea.vmem %s1032_s25, 256  ;;  %s898_s28 = smov [#allocation2]  }
  0x40   : > { %p777_p8 = scmp.ne.s32.totalorder %s1032_s25, %s776_s27  ;;  %s781_s29 = sshll.u32 %s898_s28, 4  ;;  %s782_s29 = int_to_ptr.vmem [resolvable:$false] %s781_s29 }
  0x41   : > { %s783_s23 = scalar_lea.vmem %s782_s29, 512  ;;  %p784_p3 = scmp.lt.s32.totalorder %s1032_s25, %s782_s29 }
  0x42   : > { %p779_p10 = pnand %p777_p8, %p763_p0  ;;  %p785_p7 = scmp.lt.s32.totalorder %s783_s23, %s776_s27 }
  0x44   : > { %p780_p13 = pneg %p779_p10  ;;  %p786_p9 = por %p785_p7, %p784_p3 }
  0x46   : > { %p787_p2 = pnand %p786_p9, %p780_p13 }
  0x48   : > { %790 = shalt.err (!%p787_p2)
}
  0x49   : > { %s899_s30 = smov 128   ;;  %s900_s22 = smov 8  }
  0x4a   : > { %664 = dma.hbm_to_vmem [thread:$0]  (!%p1028_p11), %s1026_s4, 256, %s1032_s25, %s1034_s5, %s899_s30, %s899_s30, %s900_s22  }
  0x4b   : > { %p1189_p0 = scmp.ne.s32.totalorder %s1184_s20, 0 }
  0x4c   : > { %s1065_s6 = sand.u32 (!%p1189_p0), 1, %s885_s13   ;;  %p1190_p5 = scmp.ne.s32.totalorder (!%p1189_p0), %s1182_s18, 0 }
  0x4d   : > { %177 = sbr.rel (%p1189_p0) target bundleno = 471 (0x1d7), region = 28  ;;  %s612_s7 = sshll.u32 (!%p1189_p0), %s1065_s6, 4 }
  0x4e   : > { %s180_s8 = scalar_lea.sflag (!%p1189_p0), [#allocation3], %s1065_s6  ;;  %s183_s9 = scalar_lea.vmem (!%p1189_p0), [#allocation2], %s612_s7 }
  0x54   : > { %864 = dma.done.wait (%p1190_p5), %s180_s8, 256  }
  0x55   : > { %866 = vsyncadd (%p1190_p5), %s180_s8, 4294967040  ;;  %p1191_p1 = scmp.eq.s32.totalorder %s947_s16, 0 }
  0x57   : > { %868 = dma.done.wait (%p1191_p1), [#allocation6], 1536   ;;  %p1192_p11 = pmov %p1191_p1 }
  0x58   : > { %v220_v0 = vlaneseq  ;;  %v901_v1 = vmov 0   ;;  %v218_v6 = vld [vmem:[%s183_s9] sm:$0xff]  ;;  %v219_v7 = vld [vmem:[%s183_s9 + $0x8] sm:$0xff]  ;;  %s902_s18 = smov 64   ;;  %vm281_vm4 = vcmask 523264   ;;  %s614_s20 = sshll.u32 %s1065_s6, 3 }
  0x59   : > { %870 = vsyncadd (%p1192_p11), [#allocation6], 4294965760  ;;  %385 = vmatprep.subr.bf16.mxu0 %v901_v1  ;;  %v250_v9 = vrot.slane %v219_v7, 7  ;;  %v263_v10 = vrot.slane %v219_v7, 1  ;;  %v716_v11 = vpack.i.bf16 %v219_v7, %v218_v6  ;;  %v249_v12 = vrot.slane %v218_v6, 7  ;;  %v721_v13 = vld [vmem:[#allocation5] sm:$0xff]  }
  0x5a   : > { %v221_v2 = vshrl.u32 %v220_v0, 7  ;;  %v262_v14 = vrot.slane %v218_v6, 1  ;;  %386 = vmatpush1.bf16.msra.mxu0 %v721_v13  ;;  %v722_v15 = vld [vmem:[#allocation5 + $0x8] sm:$0xff]   ;;  %v723_v23 = vld [vmem:[#allocation5 + $0x10] sm:$0xff]   ;;  %v724_v24 = vld [vmem:[#allocation5 + $0x18] sm:$0xff]   ;;  %s207_s4 = scalar_lea.vmem [#allocation7], %s614_s20 }
  0x5b   : > { %717 = vrot.lane.b32.xlu0 %v716_v11, %s902_s18  ;;  %387 = vmatprep.subr.bf16.mxu0 %v901_v1  ;;  %v725_v25 = vld [vmem:[#allocation5 + $0x20] sm:$0xff]   ;;  %v726_v26 = vld [vmem:[#allocation5 + $0x28] sm:$0xff]   ;;  %v727_v27 = vld [vmem:[#allocation5 + $0x30] sm:$0xff]   ;;  %s476_s25 = sshll.u32 %s207_s4, 4  ;;  %s641_s26 = sshll.u32 %s947_s16, 7  ;;  %s1093_s25 = int_to_ptr.vmem [resolvable:$true] %s476_s25 }
  0x5c   : > { %v222_v3 = vadd.s32 8, %v221_v2  ;;  %v227_v4 = vand.u32 15, %v221_v2  ;;  %vm251_vm0 = vcmp.lt.s32.totalorder %v221_v2, 1  ;;  %vm264_vm2 = vcmp.lt.s32.totalorder %v221_v2, 7  ;;  %v728_v28 = vld [vmem:[#allocation5 + $0x38] sm:$0xff]   ;;  %v729_v29 = vld [vmem:[#allocation5 + $0x40] sm:$0xff]   ;;  %s1098_s11 = scalar_lea.hbm %s1177_s2, %s641_s26 }
  0x5d   : > { %v252_v16 = vsel %vm251_vm0, %v249_v12, %v250_v9  ;;  %v253_v17 = vsel %vm251_vm0, %v250_v9, %v249_v12  ;;  %v265_v19 = vsel %vm264_vm2, %v262_v14, %v263_v10  ;;  %v266_v20 = vsel %vm264_vm2, %v263_v10, %v262_v14  ;;  %v730_v30 = vld [vmem:[#allocation5 + $0x48] sm:$0xff]   ;;  %v731_v31 = vld [vmem:[#allocation5 + $0x50] sm:$0xff]   ;;  %v732_v32 = vld [vmem:[#allocation5 + $0x58] sm:$0xff]   ;;  %s458_s27 = scalar_lea.sflag [#allocation4], %s1065_s6  ;;  %s791_s28 = scalar_lea.vmem %s1093_s25, 128 }
  0x5e   : > { %v234_v5 = vand.u32 15, %v222_v3  ;;  %vm1077_vm1 = vcmp.eq.s32.totalorder %v227_v4, 0  ;;  %388 = vmatpush1.bf16.msra.mxu0 %v722_v15  ;;  %p792_p4 = scmp.ne.s32.totalorder %s1093_s25, %s791_s28  ;;  %s903_s29 = smov [#allocation7]  }
  0x5f   : > { %v258_v18 = vsel %vm1077_vm1, 0.0, %v253_v17  ;;  %389 = vmatprep.subr.bf16.mxu0 %v901_v1  ;;  %s795_s23 = sshll.u32 %s903_s29, 4  ;;  %s796_s23 = int_to_ptr.vmem [resolvable:$false] %s795_s23 }
  0x60   : > { %vm261_vm3 = vcmp.eq.s32.totalorder %v234_v5, 15  ;;  %p793_p6 = pnand %p792_p4, %p1017_p12  ;;  %s797_s30 = scalar_lea.vmem %s796_s23, 256 }
  0x61   : > { %v272_v21 = vsel %vm261_vm3, 0.0, %v266_v20  ;;  %p798_p10 = scmp.lt.s32.totalorder %s1093_s25, %s796_s23  ;;  %p799_p13 = scmp.lt.s32.totalorder %s797_s30, %s791_s28 }
  0x62   : > { %v285_v22 = vpack.c.bf16 %v272_v21, %v265_v19  ;;  %390 = vmatpush1.bf16.msra.mxu0 %v723_v23  ;;  %p794_p8 = pneg %p793_p6 }
  0x63   : > { %391 = vmatprep.subr.bf16.mxu0 %v901_v1  ;;  %p800_p3 = por %p799_p13, %p798_p10 }
  0x64   : > { %628 = vmatprep.mubr.msk.bf16.mxu0 %vm281_vm4, %v285_v22 }
  0x65   : > { %p801_p7 = pnand %p800_p3, %p794_p8 }
  0x66   : > { %392 = vmatpush1.bf16.msra.mxu0 %v724_v24 }
  0x67   : > { %393 = vmatprep.subr.bf16.mxu0 %v901_v1 }
  0x6a   : > { %394 = vmatpush1.bf16.msra.mxu0 %v725_v25 }
  0x6b   : > { %395 = vmatprep.subr.bf16.mxu0 %v901_v1 }
  0x6e   : > { %396 = vmatpush1.bf16.msra.mxu0 %v726_v26 }
  0x6f   : > { %397 = vmatprep.subr.bf16.mxu0 %v901_v1 }
  0x72   : > { %398 = vmatpush1.bf16.msra.mxu0 %v727_v27 }
  0x73   : > { %399 = vmatprep.subr.bf16.mxu0 %v901_v1 }
  0x76   : > { %400 = vmatpush1.bf16.msra.mxu0 %v728_v28 }
  0x77   : > { %401 = vmatprep.subr.bf16.mxu0 %v901_v1 }
  0x7a   : > { %402 = vmatpush1.bf16.msra.mxu0 %v729_v29 }
  0x7b   : > { %403 = vmatprep.subr.bf16.mxu0 %v901_v1 }
  0x7e   : > { %404 = vmatpush1.bf16.msra.mxu0 %v730_v30 }
  0x7f   : > { %405 = vmatprep.subr.bf16.mxu0 %v901_v1 }
  0x82   : > { %406 = vmatpush1.bf16.msra.mxu0 %v731_v31 }
  0x83   : > { %407 = vmatprep.subr.bf16.mxu0 %v901_v1 }
  0x86   : > { %408 = vmatpush1.bf16.msra.mxu0 %v732_v32 }
  0xcd   : > { %v718_v33 = vpop.permute.xlu0 %717 }
  0xce   : > { %v720_v34 = vunpack.i.h.bf16 %v718_v33  ;;  %v719_v35 = vunpack.i.l.bf16 %v718_v33 }
  0xd0   : > { %v282_v36 = vsel %vm281_vm4, %v258_v18, %v719_v35  ;;  %v283_v37 = vsel %vm281_vm4, %v252_v16, %v720_v34 }
  0xd1   : > { %v284_v38 = vpack.c.bf16 %v283_v37, %v282_v36 }
  0xd3   : > { %418 = vmatmul.mubr.bf16.vlgmr.msra.gmra.mrb[0].mxu0 %v284_v38 }
 0x1a6   : > { %v419_v39 = vpop.f32.mrb[0].mxu0 }
 0x1a7   : > { %v421_v40 = vpop.f32.mrb[1].mxu0 }
 0x1a8   : > { %v422_v41 = vpop.f32.mrb[2].mxu0 }
 0x1a9   : > { %v426_v42 = vpack.c.bf16 %v422_v41, %v419_v39  ;;  %v424_v43 = vpop.f32.mrb[3].mxu0 }
 0x1ab   : > { %646 = vst [vmem:[%s207_s4] sm:$0xff] %v426_v42   ;;  %v436_v44 = vunpack.c.l.bf16 %v426_v42  ;;  %v437_v45 = vunpack.c.h.bf16 %v426_v42 }
 0x1ac   : > { %804 = shalt.err (!%p801_p7)
}
 0x1ad   : > { %s805_s22 = scalar_lea.hbm %s1098_s11, 128  ;;  %s809_s9 = scalar_lea.hbm %s1177_s2, 256 }
 0x1ae   : > { %p806_p9 = scmp.ne.s32.totalorder %s1098_s11, %s805_s22  ;;  %p810_p5 = scmp.lt.u32.totalorder %s1098_s11, %s1177_s2 }
 0x1af   : > { %p811_p1 = scmp.lt.u32.totalorder %s809_s9, %s805_s22  ;;  %p813_p4 = scmp.lt.u32.totalorder %s805_s22, %s1098_s11 }
 0x1b0   : > { %p807_p2 = pnand %p806_p9, %p1017_p12 }
 0x1b1   : > { %p812_p11 = por %p811_p1, %p810_p5 }
 0x1b2   : > { %p808_p0 = pneg %p807_p2 }
 0x1b3   : > { %p814_p6 = por %p813_p4, %p812_p11 }
 0x1b5   : > { %p815_p8 = pnand %p814_p6, %p808_p0 }
 0x1b7   : > { %818 = shalt.err (!%p815_p8)
}
 0x1b8   : > { %s904_s26 = smov 4   ;;  %v438_v46 = vadd.f32 %v437_v45, %v436_v44  ;;  %v445_v47 = vmul.f32 %v436_v44, %v436_v44  ;;  %v446_v48 = vmul.f32 %v437_v45, %v437_v45  ;;  %s615_s5 = sshll.u32 %s1065_s6, 1  ;;  %vm454_vm5 = vcmask 1040384  }
 0x1b9   : > { %653 = dma.vmem_to_hbm [thread:$0]  (%p1017_p12), %s1093_s25, 128, %s1098_s11, %s458_s27, %s902_s18, %s902_s18, %s904_s26  }
 0x1ba   : > { %v439_v49 = vrot.slane %v438_v46, 4  ;;  %v447_v50 = vadd.f32 %v446_v48, %v445_v47  ;;  %s635_s10 = sshll.u32 %s947_s16, 5  ;;  %s214_s18 = scalar_lea.vmem [#allocation8], %s615_s5 }
 0x1bb   : > { %s492_s25 = sshll.u32 %s214_s18, 4  ;;  %s1131_s28 = scalar_lea.hbm %s1178_s3, %s635_s10  ;;  %s1133_s25 = int_to_ptr.vmem [resolvable:$true] %s492_s25 }
 0x1bc   : > { %v440_v51 = vadd.f32 %v439_v49, %v438_v46  ;;  %v448_v52 = vrot.slane %v447_v50, 4  ;;  %s463_s29 = scalar_lea.sflag [#allocation9], %s1065_s6  ;;  %s819_s23 = scalar_lea.vmem %s1133_s25, 32 }
 0x1bd   : > { %p820_p10 = scmp.ne.s32.totalorder %s1133_s25, %s819_s23  ;;  %s905_s16 = smov [#allocation8]  }
 0x1be   : > { %v441_v53 = vrot.slane %v440_v51, 2  ;;  %v449_v54 = vadd.f32 %v448_v52, %v447_v50  ;;  %s823_s30 = sshll.u32 %s905_s16, 4  ;;  %s824_s30 = int_to_ptr.vmem [resolvable:$false] %s823_s30 }
 0x1bf   : > { %p821_p13 = pnand %p820_p10, %p1017_p12  ;;  %s825_s22 = scalar_lea.vmem %s824_s30, 64 }
 0x1c0   : > { %v442_v55 = vadd.f32 %v441_v53, %v440_v51  ;;  %v450_v56 = vrot.slane %v449_v54, 2  ;;  %p826_p7 = scmp.lt.s32.totalorder %s1133_s25, %s824_s30  ;;  %p827_p9 = scmp.lt.s32.totalorder %s825_s22, %s819_s23 }
 0x1c1   : > { %p822_p3 = pneg %p821_p13 }
 0x1c2   : > { %v443_v57 = vrot.slane %v442_v55, 1  ;;  %v451_v58 = vadd.f32 %v450_v56, %v449_v54  ;;  %p828_p2 = por %p827_p9, %p826_p7 }
 0x1c4   : > { %v452_v59 = vrot.slane %v451_v58, 1  ;;  %v444_v60 = vadd.f32 %v443_v57, %v442_v55  ;;  %p829_p0 = pnand %p828_p2, %p822_p3 }
 0x1c6   : > { %v453_v61 = vadd.f32 %v452_v59, %v451_v58 }
 0x1c8   : > { %v455_v62 = vsel %vm454_vm5, %v444_v60, %v453_v61 }
 0x1c9   : > { %456 = vst [vmem:[%s214_s18] sm:$0x3] %v455_v62 }
 0x1ca   : > { %832 = shalt.err (!%p829_p0)
}
 0x1cb   : > { %s833_s6 = scalar_lea.hbm %s1131_s28, 32  ;;  %s837_s9 = scalar_lea.hbm %s1178_s3, 64 }
 0x1cc   : > { %p834_p5 = scmp.ne.s32.totalorder %s1131_s28, %s833_s6  ;;  %p838_p4 = scmp.lt.u32.totalorder %s1131_s28, %s1178_s3 }
 0x1cd   : > { %p839_p6 = scmp.lt.u32.totalorder %s837_s9, %s833_s6  ;;  %p841_p10 = scmp.lt.u32.totalorder %s833_s6, %s1131_s28 }
 0x1ce   : > { %p835_p1 = pnand %p834_p5, %p1017_p12 }
 0x1cf   : > { %p840_p8 = por %p839_p6, %p838_p4 }
 0x1d0   : > { %p836_p11 = pneg %p835_p1 }
 0x1d1   : > { %p842_p13 = por %p841_p10, %p840_p8 }
 0x1d3   : > { %p843_p3 = pnand %p842_p13, %p836_p11 }
 0x1d5   : > { %846 = shalt.err (!%p843_p3)
}
 0x1d6   : > { %654 = dma.vmem_to_hbm [thread:$0]  (%p1017_p12), %s1133_s25, 32, %s1131_s28, %s463_s29  }
 0x1d7 PF: > { %s504_s26 = sand.u32 1, %s881_s12   ;;  %p1195_p7 = scmp.ne.s32.totalorder %s1183_s19, 0 }
 0x1d8   : > { %p1196_p9 = scmp.ge.s32.totalorder %s893_s15, 2  ;;  %s505_s5 = scalar_lea.sflag [#allocation4], %s504_s26 }
 0x1da   : > { %p666_p2 = pnand %p1196_p9, %p1195_p7 }
 0x1dc   : > { %872 = dma.done.wait (!%p666_p2), %s505_s5, 128  }
 0x1dd   : > { %874 = vsyncadd (!%p666_p2), %s505_s5, 4294967168  ;;  %s514_s10 = scalar_lea.sflag [#allocation9], %s504_s26 }
 0x1de   : > { %876 = dma.done.wait (!%p666_p2), %s514_s10, 32  }
 0x1df   : > { %878 = vsyncadd (!%p666_p2), %s514_s10, 4294967264  ;;  %p21_p12 = scmp.ge.s32.totalorder %s982_s24, 4   ;;  %s1197_s12 = smov %s885_s13 }
 0x1e0   : > { %s1198_s13 = smov %s889_s14  ;;  %s1199_s14 = smov %s1013_s17 }
 0x1e1   : > { %s1200_s15 = smov %s982_s24  ;;  %23 = sbr.rel (!%p21_p12) target bundleno = 8 (0x8), region = 94 }
 0x1e8   :  { %519 = vsyncpa [#allocation3], 1 }
 0x1e9   :  { %521 = vsyncpa [#allocation3 + $0x1], 1 }
 0x1ea   :  { %522 = vsyncpa [#allocation6], 1 }
 0x1eb   :  { %523 = vsyncpa [#allocation4], 1 }
 0x1ec   :  { %525 = vsyncpa [#allocation4 + $0x1], 1 }
 0x1ed   :  { %526 = vsyncpa [#allocation9], 1 }
 0x1ee   :  { %528 = vsyncpa [#allocation9 + $0x1], 1 }

</bundles_post_ra>
